<compile_context>
chip_gen: v7x
topology: tpu7x:2x2x1
jax: 0.10.0
libtpu: 0.0.40
codegen_flags: <defaults>
</compile_context>

<pallas_src>
import functools

import jax
import jax.numpy as jnp
from jax.experimental import pallas as pl
from jax.experimental.pallas import tpu as pltpu

NUM_CLASSES = 3


def _round_up(a, m):
    return ((a + m - 1) // m) * m


def _cdiv(a, b):
    return (a + b - 1) // b


# ---------------------------------------------------------------------------
# Kernels
# ---------------------------------------------------------------------------

def _fused_kernel(x_ref, w1_ref, b1_ref, w2_ref, b2_ref, o_ref):
    """No-reduction fast path: the whole (Hp, Hp) pooler weight is resident.

    x_ref:  (TB, Hp) bf16   input batch tile
    w1_ref: (Hp, Hp) bf16   pooler W^T (padded)
    b1_ref: (1, Hp)  f32    pooler bias
    w2_ref: (Hp, Cp) bf16   classifier W^T (3 -> 128 padded, lane-dense)
    b2_ref: (1, Cp)  f32    classifier bias
    o_ref:  (TB, Cp) f32    logits tile (lane-dense)
    """
    # Pooler matmul on the MXU with f32 accumulation; bias + tanh in f32.
    # TODO(synk): epilogue could run in bf16 on v6e/v7x (bf16 EUP); kept f32
    # so the same kernel also lowers cleanly on v5e.
    pooled = jnp.tanh(
        jnp.dot(x_ref[...], w1_ref[...], preferred_element_type=jnp.float32)
        + b1_ref[...]
    )
    # TODO(synk): nn.Dropout is identity in eval mode; training-mode masking
    # (pltpu.prng_random_bits) intentionally omitted to match inference.
    o_ref[...] = (
        jnp.dot(pooled.astype(jnp.bfloat16), w2_ref[...],
                preferred_element_type=jnp.float32)
        + b2_ref[...]
    )


def _tiled_kernel(x_ref, w1_ref, b1_ref, w2_ref, b2_ref, o_ref):
    """n-tiled reduction path (only used for very large hidden sizes).

    Grid: (batch_tiles, n_tiles); n tiles the pooler output dim (= classifier
    contraction dim).  The output block index is (i, 0) across n, so o_ref is
    resident and we accumulate directly into it (no scratch accumulator).
    """
    n = pl.program_id(1)

    pooled = jnp.tanh(
        jnp.dot(x_ref[...], w1_ref[...], preferred_element_type=jnp.float32)
        + b1_ref[...]
    )
    partial = jnp.dot(pooled.astype(jnp.bfloat16), w2_ref[...],
                      preferred_element_type=jnp.float32)

    @pl.when(n == 0)
    def _():
        o_ref[...] = b2_ref[...] + partial      # init with broadcast bias

    @pl.when(n != 0)
    def _():
        o_ref[...] += partial


# ---------------------------------------------------------------------------
# One-time parameter preparation (hoisted out of the forward call)
# ---------------------------------------------------------------------------

def prepare_params(w_pooler, b_pooler, w_cls, b_cls):
    """Transpose to (in, out), cast weights to bf16 and zero-pad to
    lane-aligned shapes ONCE.  Call this at model init, not per forward."""
    H = w_pooler.shape[1]
    C = w_cls.shape[0]
    Hp = _round_up(H, 128)                    # lane-aligned hidden dim
    Cp = _round_up(C, 128)                    # lane-dense classifier out (3 -> 128)

    w1_t = jnp.zeros((Hp, Hp), jnp.bfloat16).at[:H, :H].set(
        jnp.asarray(w_pooler).T.astype(jnp.bfloat16))
    b1_p = jnp.zeros((1, Hp), jnp.float32).at[0, :H].set(
        jnp.asarray(b_pooler, jnp.float32))
    w2_t = jnp.zeros((Hp, Cp), jnp.bfloat16).at[:H, :C].set(
        jnp.asarray(w_cls).T.astype(jnp.bfloat16))
    b2_p = jnp.zeros((1, Cp), jnp.float32).at[0, :C].set(
        jnp.asarray(b_cls, jnp.float32))
    return w1_t, b1_p, w2_t, b2_p


# ---------------------------------------------------------------------------
# Forward
# ---------------------------------------------------------------------------

@functools.partial(jax.jit, static_argnames=("num_classes",))
def pooler_classifier_forward(x, w1_t, b1_p, w2_t, b2_p, *,
                              num_classes=NUM_CLASSES):
    """x: (B, H) f32 hidden_state (CLS token).  Remaining args come from
    prepare_params().  Returns logits (B, num_classes) f32."""
    B, H = x.shape
    Hp = w1_t.shape[0]
    Cp = w2_t.shape[1]

    # ---- batch tiling: >=2 tiles whenever B >= 32 (both v7x TensorCores get
    # work); tiles capped at 512 rows so weights are not re-streamed per tiny
    # tile on v5e/v6e while keeping the double-buffered x tile small. ----
    B16 = _round_up(B, 16)                    # bf16 sublane packing
    if B16 >= 32:
        tb = min(512, _round_up(_cdiv(B16, 2), 16))
    else:
        tb = B16
    Bp = _round_up(B, tb)

    # ---- hidden tiling: no-reduction fast path whenever the full
    # double-buffered bf16 pooler weight fits comfortably in scoped VMEM
    # (Hp <= 2048 -> ~16 MiB weight, well under v6e/v7x 32 MiB scoped). ----
    fast_path = (2 * Hp * Hp * 2) <= (20 << 20)
    if fast_path:
        tn = Hp
    else:
        tn = 512 if Hp % 512 == 0 else (256 if Hp % 256 == 0 else 128)

    # ---- activation padding only when actually needed (H=768/1024 and
    # aligned batches take the plain-cast path). ----
    if Bp == B and Hp == H:
        x_p = x.astype(jnp.bfloat16)
    else:
        x_p = jnp.zeros((Bp, Hp), jnp.bfloat16).at[:B, :H].set(
            x.astype(jnp.bfloat16))

    # ---- scheduling hint for XLA ----
    cost = pl.CostEstimate(
        flops=2 * Bp * Hp * (Hp + Cp),
        transcendentals=Bp * Hp,
        bytes_accessed=(Bp * Hp * 2 + Hp * Hp * 2 + Hp * Cp * 2
                        + Bp * Cp * 4 + Hp * 4 + Cp * 4),
    )

    # ---- raise the scoped-VMEM limit only if the footprint needs it ----
    est_vmem = 2 * (tb * Hp * 2 + Hp * tn * 2 + tn * 4 + tn * Cp * 2 + Cp * 4
                    + tb * Cp * 4) + (1 << 20)
    cp_kwargs = {}
    if est_vmem > (14 << 20):
        cp_kwargs["vmem_limit_bytes"] = int(min(est_vmem + (6 << 20), 56 << 20))

    if fast_path:
        grid_spec = pltpu.PrefetchScalarGridSpec(
            num_scalar_prefetch=0,
            grid=(Bp // tb,),
            in_specs=[
                pl.BlockSpec((tb, Hp), lambda i: (i, 0)),   # x batch tile
                pl.BlockSpec((Hp, Hp), lambda i: (0, 0)),   # pooler W^T (resident)
                pl.BlockSpec((1, Hp), lambda i: (0, 0)),    # pooler bias
                pl.BlockSpec((Hp, Cp), lambda i: (0, 0)),   # classifier W^T
                pl.BlockSpec((1, Cp), lambda i: (0, 0)),    # classifier bias
            ],
            out_specs=pl.BlockSpec((tb, Cp), lambda i: (i, 0)),
        )
        kernel = _fused_kernel
        dims = ("parallel",)
    else:
        grid_spec = pltpu.PrefetchScalarGridSpec(
            num_scalar_prefetch=0,
            grid=(Bp // tb, Hp // tn),
            in_specs=[
                pl.BlockSpec((tb, Hp), lambda i, n: (i, 0)),   # x tile (full K)
                pl.BlockSpec((Hp, tn), lambda i, n: (0, n)),   # pooler W^T n-slice
                pl.BlockSpec((1, tn), lambda i, n: (0, n)),    # pooler bias slice
                pl.BlockSpec((tn, Cp), lambda i, n: (n, 0)),   # classifier W^T slice
                pl.BlockSpec((1, Cp), lambda i, n: (0, 0)),    # classifier bias
            ],
            out_specs=pl.BlockSpec((tb, Cp), lambda i, n: (i, 0)),
        )
        kernel = _tiled_kernel
        dims = ("parallel", "arbitrary")

    out_padded = pl.pallas_call(
        kernel,
        out_shape=jax.ShapeDtypeStruct((Bp, Cp), jnp.float32),
        grid_spec=grid_spec,
        compiler_params=pltpu.CompilerParams(
            dimension_semantics=dims, **cp_kwargs),
        cost_estimate=cost,
    )(x_p, w1_t, b1_p, w2_t, b2_p)

    return out_padded[:B, :num_classes]


# ---------------------------------------------------------------------------
# Reference + demo
# ---------------------------------------------------------------------------

def _init_linear(key, out_features, in_features):
    # Deterministic init mimicking nn.Linear default: U(-1/sqrt(in), 1/sqrt(in))
    kw, kb = jax.random.split(key)
    bound = 1.0 / jnp.sqrt(jnp.float32(in_features))
    w = jax.random.uniform(
        kw, (out_features, in_features), jnp.float32, -bound, bound)
    b = jax.random.uniform(kb, (out_features,), jnp.float32, -bound, bound)
    return w, b


def _reference(x, w1, b1, w2, b2):
    pooled = jnp.tanh(x @ w1.T + b1)
    return pooled @ w2.T + b2


if __name__ == "__main__":
    B, H = 8, 32  # small shapes: batch=8, hidden_size=32
    key = jax.random.PRNGKey(0)
    kx, kp, kc = jax.random.split(key, 3)

    x = jax.random.normal(kx, (B, H), jnp.float32)
    w_pooler, b_pooler = _init_linear(kp, H, H)        # Linear(hidden, hidden)
    w_cls, b_cls = _init_linear(kc, NUM_CLASSES, H)    # Linear(hidden, 3)

    # One-time weight prep (hoisted out of the per-call forward).
    params = prepare_params(w_pooler, b_pooler, w_cls, b_cls)
    params = jax.block_until_ready(params)

    logits = pooler_classifier_forward(x, *params)
    logits = jax.block_until_ready(logits)

    ref = _reference(x, w_pooler, b_pooler, w_cls, b_cls)
    assert logits.shape == (B, NUM_CLASSES)
    # bf16 activations/weights on the MXU -> relaxed tolerance vs f32 reference.
    assert jnp.allclose(logits, ref, atol=3e-2, rtol=3e-2), "mismatch vs reference"

    print("KERNEL_OK")
</pallas_src>

<mosaic_0001>
module attributes {stable_mosaic.version = 11 : i64} {
  func.func @_fused_kernel(%arg0: i32, %arg1: memref<16x128xbf16, #tpu.memory_space<vmem>>, %arg2: memref<128x128xbf16, #tpu.memory_space<vmem>>, %arg3: memref<1x128xf32, #tpu.memory_space<vmem>>, %arg4: memref<128x128xbf16, #tpu.memory_space<vmem>>, %arg5: memref<1x128xf32, #tpu.memory_space<vmem>>, %arg6: memref<16x128xf32, #tpu.memory_space<vmem>>) attributes {dimension_semantics = [#tpu.dimension_semantics<parallel>], iteration_bounds = array<i64: 1>, scalar_prefetch = 0 : i64, scratch_operands = 0 : i64, tpu.core_type = #tpu.core_type<tc>, window_params = [{transform_indices = @transform_0, window_bounds = array<i64: 16, 128>}, {pipeline_mode = #tpu.pipeline_mode<synchronous>, transform_indices = @transform_1, window_bounds = array<i64: 128, 128>}, {pipeline_mode = #tpu.pipeline_mode<synchronous>, transform_indices = @transform_2, window_bounds = array<i64: 1, 128>}, {pipeline_mode = #tpu.pipeline_mode<synchronous>, transform_indices = @transform_3, window_bounds = array<i64: 128, 128>}, {pipeline_mode = #tpu.pipeline_mode<synchronous>, transform_indices = @transform_4, window_bounds = array<i64: 1, 128>}, {transform_indices = @transform_5, window_bounds = array<i64: 16, 128>}]} {
    %c0 = arith.constant 0 : index
    %c0_0 = arith.constant 0 : index
    %0 = vector.load %arg1[%c0, %c0_0] : memref<16x128xbf16, #tpu.memory_space<vmem>>, vector<16x128xbf16>
    %c0_1 = arith.constant 0 : index
    %c0_2 = arith.constant 0 : index
    %1 = vector.load %arg2[%c0_1, %c0_2] : memref<128x128xbf16, #tpu.memory_space<vmem>>, vector<128x128xbf16>
    %cst = arith.constant dense<0.000000e+00> : vector<16x128xf32>
    %2 = tpu.matmul %0, %1, %cst {dimension_numbers = #tpu.dot_dimension_numbers<[1], [0], [0], [1], [0, 0, 1, 1], [], []>} : vector<16x128xbf16>, vector<128x128xbf16>, vector<16x128xf32> -> vector<16x128xf32>
    %c0_3 = arith.constant 0 : index
    %c0_4 = arith.constant 0 : index
    %3 = vector.load %arg3[%c0_3, %c0_4] : memref<1x128xf32, #tpu.memory_space<vmem>>, vector<1x128xf32>
    %4 = vector.broadcast %3 : vector<1x128xf32> to vector<16x128xf32>
    %5 = arith.addf %2, %4 : vector<16x128xf32>
    %6 = math.tanh %5 : vector<16x128xf32>
    %7 = arith.truncf %6 : vector<16x128xf32> to vector<16x128xbf16>
    %c0_5 = arith.constant 0 : index
    %c0_6 = arith.constant 0 : index
    %8 = vector.load %arg4[%c0_5, %c0_6] : memref<128x128xbf16, #tpu.memory_space<vmem>>, vector<128x128xbf16>
    %cst_7 = arith.constant dense<0.000000e+00> : vector<16x128xf32>
    %9 = tpu.matmul %7, %8, %cst_7 {dimension_numbers = #tpu.dot_dimension_numbers<[1], [0], [0], [1], [0, 0, 1, 1], [], []>} : vector<16x128xbf16>, vector<128x128xbf16>, vector<16x128xf32> -> vector<16x128xf32>
    %c0_8 = arith.constant 0 : index
    %c0_9 = arith.constant 0 : index
    %10 = vector.load %arg5[%c0_8, %c0_9] : memref<1x128xf32, #tpu.memory_space<vmem>>, vector<1x128xf32>
    %11 = vector.broadcast %10 : vector<1x128xf32> to vector<16x128xf32>
    %12 = arith.addf %9, %11 : vector<16x128xf32>
    %c0_10 = arith.constant 0 : index
    %c0_11 = arith.constant 0 : index
    %13 = vector.load %arg6[%c0_10, %c0_11] : memref<16x128xf32, #tpu.memory_space<vmem>>, vector<16x128xf32>
    tpu.vector_store %arg6[%c0_10, %c0_11], %12 {strides = array<i32>} : memref<16x128xf32, #tpu.memory_space<vmem>>, vector<16x128xf32>,
    return
  }
  func.func @transform_0(%arg0: i32) -> (i32, i32) {
    %c0_i32 = arith.constant 0 : i32
    %c0_i32_0 = arith.constant 0 : i32
    return %arg0, %c0_i32 : i32, i32
  }
  func.func @transform_1(%arg0: i32) -> (i32, i32) {
    %c0_i32 = arith.constant 0 : i32
    %c0_i32_0 = arith.constant 0 : i32
    %c0_i32_1 = arith.constant 0 : i32
    return %c0_i32, %c0_i32_0 : i32, i32
  }
  func.func @transform_2(%arg0: i32) -> (i32, i32) {
    %c0_i32 = arith.constant 0 : i32
    %c0_i32_0 = arith.constant 0 : i32
    %c0_i32_1 = arith.constant 0 : i32
    return %c0_i32, %c0_i32_0 : i32, i32
  }
  func.func @transform_3(%arg0: i32) -> (i32, i32) {
    %c0_i32 = arith.constant 0 : i32
    %c0_i32_0 = arith.constant 0 : i32
    %c0_i32_1 = arith.constant 0 : i32
    return %c0_i32, %c0_i32_0 : i32, i32
  }
  func.func @transform_4(%arg0: i32) -> (i32, i32) {
    %c0_i32 = arith.constant 0 : i32
    %c0_i32_0 = arith.constant 0 : i32
    %c0_i32_1 = arith.constant 0 : i32
    return %c0_i32, %c0_i32_0 : i32, i32
  }
  func.func @transform_5(%arg0: i32) -> (i32, i32) {
    %c0_i32 = arith.constant 0 : i32
    %c0_i32_0 = arith.constant 0 : i32
    return %arg0, %c0_i32 : i32, i32
  }
}

</mosaic_0001>

<bundles_post_ra>
// kernel: pooler_classifier_forward.1
= control target key start
LH: loop header
LB: loop body
LE: loop exit
PB: predicated region body
PF: predicated region fallthrough
CT: control target
= control target key end

     0   :  { %10 = vsyncpa [#allocation3], 0  ;;  %s519_s0 = inlined_call_operand.vmem [shape: bf16[16,128], index: 0, kind: input, shape index: {}]   ;;  %s520_s1 = inlined_call_operand.hbm [shape: bf16[128,128], index: 1, kind: input, shape index: {}]   ;;  %s521_s2 = inlined_call_operand.vmem [shape: f32[1,128], index: 2, kind: input, shape index: {}]   ;;  %s522_s3 = inlined_call_operand.hbm [shape: bf16[128,128], index: 3, kind: input, shape index: {}]   ;;  %s523_s4 = inlined_call_operand.vmem [shape: f32[1,128], index: 4, kind: input, shape index: {}]   ;;  %s524_s5 = inlined_call_operand.vmem [shape: f32[16,128], index: 5, kind: output, shape index: {}]  }
   0x1   :  { %11 = vsyncpa [#allocation5], 0  ;;  %s444_s18 = smov [#allocation2]   ;;  %s396_s22 = scalar_lea.hbm %s520_s1, 1024 }
   0x2   :  { %s19_s19 = sshll.u32 %s444_s18, 4  ;;  %p397_p0 = scmp.ne.s32.totalorder %s520_s1, %s396_s22  ;;  %s20_s19 = int_to_ptr.vmem [resolvable:$true] %s19_s19 }
   0x3   :  { %p400_p1 = scmp.lt.u32.totalorder %s396_s22, %s520_s1 }
   0x5   :  { %p402_p2 = pnand %p400_p1, %p397_p0 }
   0x7   :  { %405 = shalt.err (!%p402_p2)
}
   0x8   :  { %s406_s27 = scalar_lea.vmem %s20_s19, 1024  ;;  %p411_p4 = scmp.lt.s32.totalorder %s20_s19, %s20_s19 }
   0x9   :  { %p407_p3 = scmp.ne.s32.totalorder %s20_s19, %s406_s27  ;;  %p412_p5 = scmp.lt.s32.totalorder %s406_s27, %s406_s27 }
   0xb   :  { %p413_p6 = por %p412_p5, %p411_p4 }
   0xd   :  { %p414_p7 = pnand %p413_p6, %p407_p3 }
   0xf   :  { %417 = shalt.err (!%p414_p7)
}
  0x10   :  { %s445_s28 = smov 64   ;;  %s446_s29 = smov 4  }
  0x11   :  { %25 = dma.hbm_to_vmem [thread:$0]  %s520_s1, 1024, %s20_s19, [#allocation3], %s445_s28, %s445_s28, %s446_s29  }
  0x12   :  { %s447_s7 = smov [#allocation4]   ;;  %s418_s11 = scalar_lea.hbm %s522_s3, 1024 }
  0x13   :  { %s33_s8 = sshll.u32 %s447_s7, 4  ;;  %p419_p8 = scmp.ne.s32.totalorder %s522_s3, %s418_s11  ;;  %s34_s8 = int_to_ptr.vmem [resolvable:$true] %s33_s8 }
  0x14   :  { %p422_p9 = scmp.lt.u32.totalorder %s418_s11, %s522_s3 }
  0x16   :  { %p424_p10 = pnand %p422_p9, %p419_p8 }
  0x18   :  { %427 = shalt.err (!%p424_p10)
}
  0x19   :  { %s428_s16 = scalar_lea.vmem %s34_s8, 1024  ;;  %p433_p12 = scmp.lt.s32.totalorder %s34_s8, %s34_s8 }
  0x1a   :  { %p429_p11 = scmp.ne.s32.totalorder %s34_s8, %s428_s16  ;;  %p434_p13 = scmp.lt.s32.totalorder %s428_s16, %s428_s16 }
  0x1c   :  { %p435_p0 = por %p434_p13, %p433_p12 }
  0x1e   :  { %p436_p1 = pnand %p435_p0, %p429_p11 }
  0x20   :  { %439 = shalt.err (!%p436_p1)
}
  0x21   :  { %39 = dma.hbm_to_vmem [thread:$0]  %s522_s3, 1024, %s34_s8, [#allocation5], %s445_s28, %s445_s28, %s446_s29  }
  0x22   :  { %440 = dma.done.wait [#allocation3], 1024  }
  0x23   :  { %441 = vsyncadd [#allocation3], 4294966272 }
  0x24   :  { %442 = dma.done.wait [#allocation5], 1024  }
  0x25   :  { %443 = vsyncadd [#allocation5], 4294966272  ;;  %v448_v0 = vmov 0.0   ;;  %vm449_vm0 = vmmov 0   ;;  %v375_v1 = vld [vmem:[#allocation2] sm:$0xff]   ;;  %v376_v2 = vld [vmem:[#allocation2 + $0x8] sm:$0xff]  }
  0x26   :  { %329 = vmatprep.subr.bf16.mxu0 %v448_v0  ;;  %345 = vmatprep.mubr.msk.bf16.mxu0 %vm449_vm0, %v448_v0  ;;  %v377_v3 = vld [vmem:[#allocation2 + $0x10] sm:$0xff]   ;;  %v384_v4 = vld [vmem:[#allocation4] sm:$0xff]   ;;  %v378_v5 = vld [vmem:[#allocation2 + $0x18] sm:$0xff]  }
  0x27   :  { %349 = vmatprep.subr.bf16.mxu1 %v448_v0  ;;  %365 = vmatprep.mubr.msk.bf16.mxu1 %vm449_vm0, %v448_v0  ;;  %v385_v6 = vld [vmem:[#allocation4 + $0x8] sm:$0xff]   ;;  %v379_v7 = vld [vmem:[#allocation2 + $0x20] sm:$0xff]   ;;  %v386_v8 = vld [vmem:[#allocation4 + $0x10] sm:$0xff]  }
  0x28   :  { %330 = vmatpush3.bf16.msra.mxu0 %v375_v1  ;;  %350 = vmatpush3.bf16.msra.mxu1 %v384_v4  ;;  %v380_v9 = vld [vmem:[#allocation2 + $0x28] sm:$0xff]   ;;  %v387_v10 = vld [vmem:[#allocation4 + $0x18] sm:$0xff]   ;;  %v381_v11 = vld [vmem:[#allocation2 + $0x30] sm:$0xff]  }
  0x29   :  { %331 = vmatprep.subr.bf16.mxu0 %v448_v0  ;;  %351 = vmatprep.subr.bf16.mxu1 %v448_v0  ;;  %v382_v12 = vld [vmem:[#allocation2 + $0x38] sm:$0xff]   ;;  %v383_v13 = vld [vmem:[%s519_s0] sm:$0xff]   ;;  %v389_v15 = vld [vmem:[#allocation4 + $0x28] sm:$0xff]  }
  0x2a   :  { %v388_v14 = vld [vmem:[#allocation4 + $0x20] sm:$0xff]   ;;  %v390_v16 = vld [vmem:[#allocation4 + $0x30] sm:$0xff]   ;;  %v391_v17 = vld [vmem:[#allocation4 + $0x38] sm:$0xff]  }
  0x2b   :  { %v292_v18 = vld [vmem:[%s521_s2] ss:$0 sm:$0xff] }
  0x2c   :  { %332 = vmatpush3.bf16.msra.mxu0 %v376_v2  ;;  %352 = vmatpush3.bf16.msra.mxu1 %v385_v6  ;;  %v302_v28 = vld [vmem:[%s523_s4] ss:$0 sm:$0xff] }
  0x2d   :  { %333 = vmatprep.subr.bf16.mxu0 %v448_v0  ;;  %353 = vmatprep.subr.bf16.mxu1 %v448_v0 }
  0x30   :  { %334 = vmatpush3.bf16.msra.mxu0 %v377_v3  ;;  %354 = vmatpush3.bf16.msra.mxu1 %v386_v8 }
  0x31   :  { %335 = vmatprep.subr.bf16.mxu0 %v448_v0  ;;  %355 = vmatprep.subr.bf16.mxu1 %v448_v0 }
  0x34   :  { %336 = vmatpush3.bf16.msra.mxu0 %v378_v5  ;;  %356 = vmatpush3.bf16.msra.mxu1 %v387_v10 }
  0x35   :  { %337 = vmatprep.subr.bf16.mxu0 %v448_v0  ;;  %357 = vmatprep.subr.bf16.mxu1 %v448_v0 }
  0x38   :  { %338 = vmatpush3.bf16.msra.mxu0 %v379_v7  ;;  %358 = vmatpush3.bf16.msra.mxu1 %v388_v14 }
  0x39   :  { %339 = vmatprep.subr.bf16.mxu0 %v448_v0  ;;  %359 = vmatprep.subr.bf16.mxu1 %v448_v0 }
  0x3c   :  { %340 = vmatpush3.bf16.msra.mxu0 %v380_v9  ;;  %360 = vmatpush3.bf16.msra.mxu1 %v389_v15 }
  0x3d   :  { %341 = vmatprep.subr.bf16.mxu0 %v448_v0  ;;  %361 = vmatprep.subr.bf16.mxu1 %v448_v0 }
  0x40   :  { %342 = vmatpush3.bf16.msra.mxu0 %v381_v11  ;;  %362 = vmatpush3.bf16.msra.mxu1 %v390_v16 }
  0x41   :  { %343 = vmatprep.subr.bf16.mxu0 %v448_v0  ;;  %363 = vmatprep.subr.bf16.mxu1 %v448_v0 }
  0x44   :  { %344 = vmatpush3.bf16.msra.mxu0 %v382_v12  ;;  %364 = vmatpush3.bf16.msra.mxu1 %v391_v17 }
  0x47   :  { %346 = vmatmul.mubr.bf16.vlgmr.msra.gmra.mrb[0].mxu0 %v383_v13 }
 0x11a   :  { %v162_v19 = vpop.f32.mrb[0].mxu0 }
 0x11b   :  { %v163_v20 = vadd.f32 %v292_v18, %v162_v19  ;;  %v347_v21 = vpop.f32.mrb[1].mxu0 }
 0x11c   :  { %v165_v22 = vpop.f32.mrb[2].mxu0 }
 0x11d   :  { %v166_v23 = vadd.f32 %v292_v18, %v165_v22  ;;  %v348_v24 = vpop.f32.mrb[3].mxu0  ;;  %392 = vtanh.f32 %v163_v20 }
 0x11f   :  { %394 = vtanh.f32 %v166_v23 }
 0x127   :  { %v393_v25 = vpop.eup %392 }
 0x129   :  { %v395_v26 = vpop.eup %394 }
 0x12a   :  { %v171_v27 = vpack.c.bf16 %v395_v26, %v393_v25 }
 0x12c   :  { %366 = vmatmul.mubr.bf16.vlgmr.msra.gmra.mrb[0].mxu1 %v171_v27 }
 0x1ff   :  { %v277_v29 = vpop.f32.mrb[0].mxu1 }
 0x200   :  { %v278_v30 = vadd.f32 %v302_v28, %v277_v29  ;;  %v367_v31 = vpop.f32.mrb[1].mxu1 }
 0x201   :  { %v280_v32 = vpop.f32.mrb[2].mxu1 }
 0x202   :  { %284 = vst [vmem:[%s524_s5] sm:$0xff] %v278_v30  ;;  %v281_v33 = vadd.f32 %v302_v28, %v280_v32  ;;  %v368_v34 = vpop.f32.mrb[3].mxu1 }
 0x204   :  { %285 = vst [vmem:[%s524_s5 + $0x8] sm:$0xff] %v281_v33 }
 0x205   :  { %290 = vsyncpa [#allocation3], 1 }
 0x206   :  { %291 = vsyncpa [#allocation5], 1 }

</bundles_post_ra>
